<compile_context>
chip_gen: v5e
topology: v5e:2x2
jax: 0.10.0
libtpu: 0.0.40
codegen_flags: <defaults>
</compile_context>

<pallas_src>
import functools

import jax
import jax.numpy as jnp
from jax.experimental import pallas as pl
from jax.experimental.pallas import tpu as pltpu

INPUT_SIZE = 63
H1 = 128
H2 = 256
NUM_CLASSES = 29
C_PAD = 128                      # logits padded 29 -> 128 lanes for dense stores
BN_EPS = 1e-5
BIAS_PACK = H1 + H2 + C_PAD      # 512, lane-aligned packed biases
BM_DEFAULT = 4096                # batch tile; step-overhead bound, not VMEM bound


def _round_up(n, m):
    return ((n + m - 1) // m) * m


def _mlp_kernel(x_ref, w1_ref, w2_ref, w3_ref, bias_ref, o_ref):
    cdt = w1_ref.dtype  # MXU operand dtype (bf16 or f32)

    b1 = bias_ref[:, 0:H1]                       # (1, 128) f32
    b2 = bias_ref[:, H1:H1 + H2]                 # (1, 256) f32
    b3 = bias_ref[:, H1 + H2:H1 + H2 + C_PAD]    # (1, 128) f32 (cols >= 29 are 0)

    # In-kernel cast of the raw f32 x tile (VPU work hidden under the matmuls).
    x = x_ref[...].astype(cdt)

    # Linear(63 -> 128) + bias + ReLU   (BN1 already folded into W2/b2)
    h1 = jnp.dot(x, w1_ref[...], preferred_element_type=jnp.float32) + b1
    h1 = jnp.maximum(h1, 0.0).astype(cdt)

    # Linear(128 -> 256) + bias + ReLU  (BN2 already folded into W3/b3)
    h2 = jnp.dot(h1, w2_ref[...], preferred_element_type=jnp.float32) + b2
    h2 = jnp.maximum(h2, 0.0).astype(cdt)

    # Linear(256 -> 29), padded to 128 output lanes (cols 29..127 stay 0).
    o_ref[...] = jnp.dot(h2, w3_ref[...], preferred_element_type=jnp.float32) + b3


def prepare_params(params, compute_dtype=jnp.bfloat16):
    """One-time param preprocessing: BN fold, output-lane padding, bias packing."""
    (w1, b1, g1, beta1, m1, v1,
     w2, b2, g2, beta2, m2, v2,
     w3, b3) = params

    # BatchNorm (eval) as per-feature affine.
    s1 = g1 / jnp.sqrt(v1 + BN_EPS)
    t1 = beta1 - m1 * s1
    s2 = g2 / jnp.sqrt(v2 + BN_EPS)
    t2 = beta2 - m2 * s2

    # Fold BN affine into the next Linear (legal: BN sits between ReLU and the
    # next Linear, and Linear is affine).
    w2f = s1[:, None] * w2
    b2f = b2 + t1 @ w2
    w3f = s2[:, None] * w3
    b3f = b3 + t2 @ w3

    # Lane-dense output: pad W3 columns 29 -> 128 with zeros.
    w3p = jnp.pad(w3f, ((0, 0), (0, C_PAD - NUM_CLASSES)))

    # Pack the three biases into one lane-aligned f32 row (slots at 0/128/384).
    bias = jnp.zeros((1, BIAS_PACK), jnp.float32)
    bias = bias.at[0, 0:H1].set(b1)
    bias = bias.at[0, H1:H1 + H2].set(b2f)
    bias = bias.at[0, H1 + H2:H1 + H2 + NUM_CLASSES].set(b3f)

    return (w1.astype(compute_dtype),     # (63, 128)  -- K kept at 63, no pad
            w2f.astype(compute_dtype),    # (128, 256) BN1 folded
            w3p.astype(compute_dtype),    # (256, 128) BN2 folded + lane pad
            bias)                         # (1, 512)   f32


@functools.partial(jax.jit, static_argnames=("block_m",))
def landmark_classifier_forward(x, prepared, block_m=None):
    """x: [B, 63] float32 -> logits [B, 29] float32.

    `prepared` is the output of prepare_params(). `block_m`, if given, is
    rounded up to a multiple of 8.
    """
    w1, w2, w3, bias = prepared
    B = x.shape[0]
    if x.dtype != jnp.float32:
        x = x.astype(jnp.float32)

    if block_m is not None:
        bm = _round_up(block_m, 8)
    else:
        # >= 2 grid steps when B allows (v7x megacore), capped at BM_DEFAULT.
        bm = min(BM_DEFAULT, max(16, _round_up(pl.cdiv(B, 2), 16)))
    grid_m = pl.cdiv(B, bm)   # ragged last block handled by Pallas (clipped)

    flops = 2 * B * (INPUT_SIZE * H1 + H1 * H2 + H2 * C_PAD)
    bytes_accessed = (B * INPUT_SIZE * 4 + B * C_PAD * 4
                      + (INPUT_SIZE * H1 + H1 * H2 + H2 * C_PAD)
                      * jnp.dtype(w1.dtype).itemsize
                      + BIAS_PACK * 4)

    out = pl.pallas_call(
        _mlp_kernel,
        out_shape=jax.ShapeDtypeStruct((B, C_PAD), jnp.float32),
        grid=(grid_m,),
        in_specs=[
            # Raw f32 x tile; 63 == full feature dim so (bm, 63) is legal.
            # (If profiling ever shows the x DMA exposed, switch this spec to
            #  pipeline_mode=pl.Buffered(3).)
            pl.BlockSpec((bm, INPUT_SIZE), lambda i: (i, 0)),
            pl.BlockSpec((INPUT_SIZE, H1), lambda i: (0, 0)),    # W1 (resident)
            pl.BlockSpec((H1, H2), lambda i: (0, 0)),            # W2' (resident)
            pl.BlockSpec((H2, C_PAD), lambda i: (0, 0)),         # W3' (resident)
            pl.BlockSpec((1, BIAS_PACK), lambda i: (0, 0)),      # packed biases
        ],
        out_specs=pl.BlockSpec((bm, C_PAD), lambda i: (i, 0)),   # lane-dense store
        compiler_params=pltpu.CompilerParams(
            dimension_semantics=("parallel",),
            # v5e scoped-VMEM default (16 MiB) would trip at bm=4096 with the
            # 128-wide f32 output block; explicit limit is safe on all gens.
            vmem_limit_bytes=48 * 1024 * 1024),
        cost_estimate=pl.CostEstimate(
            flops=flops, transcendentals=0, bytes_accessed=bytes_accessed),
    )(x, w1, w2, w3, bias)

    return out[:, :NUM_CLASSES]


def init_params(key):
    """PyTorch-like Linear init; non-trivial BatchNorm stats so the BN-folding
    path is actually exercised by the correctness check."""
    ks = jax.random.split(key, 14)

    def linear(kw, kb, fan_in, fan_out):
        bound = 1.0 / jnp.sqrt(fan_in)
        w = jax.random.uniform(kw, (fan_in, fan_out), jnp.float32, -bound, bound)
        b = jax.random.uniform(kb, (fan_out,), jnp.float32, -bound, bound)
        return w, b

    w1, b1 = linear(ks[0], ks[1], INPUT_SIZE, H1)
    w2, b2 = linear(ks[2], ks[3], H1, H2)
    w3, b3 = linear(ks[4], ks[5], H2, NUM_CLASSES)

    g1 = jax.random.uniform(ks[6], (H1,), jnp.float32, 0.5, 1.5)
    beta1 = 0.1 * jax.random.normal(ks[7], (H1,), jnp.float32)
    m1 = 0.1 * jax.random.normal(ks[8], (H1,), jnp.float32)
    v1 = jax.random.uniform(ks[9], (H1,), jnp.float32, 0.5, 1.5)
    g2 = jax.random.uniform(ks[10], (H2,), jnp.float32, 0.5, 1.5)
    beta2 = 0.1 * jax.random.normal(ks[11], (H2,), jnp.float32)
    m2 = 0.1 * jax.random.normal(ks[12], (H2,), jnp.float32)
    v2 = jax.random.uniform(ks[13], (H2,), jnp.float32, 0.5, 1.5)

    return (w1, b1, g1, beta1, m1, v1,
            w2, b2, g2, beta2, m2, v2,
            w3, b3)


def _reference(x, params):
    (w1, b1, g1, beta1, m1, v1,
     w2, b2, g2, beta2, m2, v2,
     w3, b3) = params
    h = jnp.maximum(x @ w1 + b1, 0.0)
    h = (h - m1) / jnp.sqrt(v1 + BN_EPS) * g1 + beta1
    h = jnp.maximum(h @ w2 + b2, 0.0)
    h = (h - m2) / jnp.sqrt(v2 + BN_EPS) * g2 + beta2
    return h @ w3 + b3


if __name__ == "__main__":
    key = jax.random.PRNGKey(0)
    k_param, k_x1, k_x2 = jax.random.split(key, 3)

    params = init_params(k_param)

    # --- small batch, f32 weights (tight check); default bm=16 -> grid=(2,) ---
    B = 32
    x = jax.random.normal(k_x1, (B, INPUT_SIZE), jnp.float32)
    prep_f32 = prepare_params(params, compute_dtype=jnp.float32)
    out = jax.block_until_ready(landmark_classifier_forward(x, prep_f32))
    ref = _reference(x, params)
    assert out.shape == (B, NUM_CLASSES), out.shape
    assert jnp.allclose(out, ref, atol=1e-4, rtol=1e-4), (
        float(jnp.max(jnp.abs(out - ref))))

    # --- same batch, bf16 dot operands (default deploy path, loose check) ---
    prep_bf16 = prepare_params(params, compute_dtype=jnp.bfloat16)
    out_bf = jax.block_until_ready(landmark_classifier_forward(x, prep_bf16))
    assert out_bf.shape == (B, NUM_CLASSES), out_bf.shape
    assert jnp.allclose(out_bf, ref, atol=5e-2, rtol=5e-2), (
        float(jnp.max(jnp.abs(out_bf - ref))))

    # --- ragged batch with an explicit small tile: B=100, block_m=32 ->
    #     grid=(4,), last block is a partial (ragged) block clipped on write. ---
    B2 = 100
    x2 = jax.random.normal(k_x2, (B2, INPUT_SIZE), jnp.float32)
    out2 = jax.block_until_ready(
        landmark_classifier_forward(x2, prep_f32, block_m=32))
    ref2 = _reference(x2, params)
    assert out2.shape == (B2, NUM_CLASSES), out2.shape
    assert jnp.allclose(out2, ref2, atol=1e-4, rtol=1e-4), (
        float(jnp.max(jnp.abs(out2 - ref2))))

    print("KERNEL_OK")
</pallas_src>

<mosaic_0001>
module attributes {stable_mosaic.version = 11 : i64} {
  func.func @_mlp_kernel(%arg0: i32, %arg1: memref<16x63xf32, #tpu.memory_space<vmem>>, %arg2: memref<63x128xf32, #tpu.memory_space<vmem>>, %arg3: memref<128x256xf32, #tpu.memory_space<vmem>>, %arg4: memref<256x128xf32, #tpu.memory_space<vmem>>, %arg5: memref<1x512xf32, #tpu.memory_space<vmem>>, %arg6: memref<16x128xf32, #tpu.memory_space<vmem>>) attributes {dimension_semantics = [#tpu.dimension_semantics<parallel>], iteration_bounds = array<i64: 2>, scalar_prefetch = 0 : i64, scratch_operands = 0 : i64, tpu.core_type = #tpu.core_type<tc>, window_params = [{transform_indices = @transform_0, window_bounds = array<i64: 16, 63>}, {pipeline_mode = #tpu.pipeline_mode<synchronous>, transform_indices = @transform_1, window_bounds = array<i64: 63, 128>}, {pipeline_mode = #tpu.pipeline_mode<synchronous>, transform_indices = @transform_2, window_bounds = array<i64: 128, 256>}, {pipeline_mode = #tpu.pipeline_mode<synchronous>, transform_indices = @transform_3, window_bounds = array<i64: 256, 128>}, {pipeline_mode = #tpu.pipeline_mode<synchronous>, transform_indices = @transform_4, window_bounds = array<i64: 1, 512>}, {transform_indices = @transform_5, window_bounds = array<i64: 16, 128>}]} {
    %c0 = arith.constant 0 : index
    %c0_0 = arith.constant 0 : index
    %0 = vector.load %arg5[%c0, %c0_0] : memref<1x512xf32, #tpu.memory_space<vmem>>, vector<1x128xf32>
    %c0_1 = arith.constant 0 : index
    %c128 = arith.constant 128 : index
    %1 = vector.load %arg5[%c0_1, %c128] : memref<1x512xf32, #tpu.memory_space<vmem>>, vector<1x256xf32>
    %c0_2 = arith.constant 0 : index
    %c384 = arith.constant 384 : index
    %2 = vector.load %arg5[%c0_2, %c384] : memref<1x512xf32, #tpu.memory_space<vmem>>, vector<1x128xf32>
    %c0_3 = arith.constant 0 : index
    %c0_4 = arith.constant 0 : index
    %3 = vector.load %arg1[%c0_3, %c0_4] : memref<16x63xf32, #tpu.memory_space<vmem>>, vector<16x63xf32>
    %c0_5 = arith.constant 0 : index
    %c0_6 = arith.constant 0 : index
    %4 = vector.load %arg2[%c0_5, %c0_6] : memref<63x128xf32, #tpu.memory_space<vmem>>, vector<63x128xf32>
    %cst = arith.constant dense<0.000000e+00> : vector<16x128xf32>
    %5 = tpu.matmul %3, %4, %cst {dimension_numbers = #tpu.dot_dimension_numbers<[1], [0], [0], [1], [0, 0, 1, 1], [], []>} : vector<16x63xf32>, vector<63x128xf32>, vector<16x128xf32> -> vector<16x128xf32>
    %6 = vector.broadcast %0 : vector<1x128xf32> to vector<16x128xf32>
    %7 = arith.addf %5, %6 : vector<16x128xf32>
    %cst_7 = arith.constant 0.000000e+00 : f32
    %8 = vector.broadcast %cst_7 : f32 to vector<16x128xf32>
    %9 = arith.maximumf %7, %8 : vector<16x128xf32>
    %c0_8 = arith.constant 0 : index
    %c0_9 = arith.constant 0 : index
    %10 = vector.load %arg3[%c0_8, %c0_9] : memref<128x256xf32, #tpu.memory_space<vmem>>, vector<128x256xf32>
    %cst_10 = arith.constant dense<0.000000e+00> : vector<16x256xf32>
    %11 = tpu.matmul %9, %10, %cst_10 {dimension_numbers = #tpu.dot_dimension_numbers<[1], [0], [0], [1], [0, 0, 1, 1], [], []>} : vector<16x128xf32>, vector<128x256xf32>, vector<16x256xf32> -> vector<16x256xf32>
    %12 = vector.broadcast %1 : vector<1x256xf32> to vector<16x256xf32>
    %13 = arith.addf %11, %12 : vector<16x256xf32>
    %cst_11 = arith.constant 0.000000e+00 : f32
    %14 = vector.broadcast %cst_11 : f32 to vector<16x256xf32>
    %15 = arith.maximumf %13, %14 : vector<16x256xf32>
    %c0_12 = arith.constant 0 : index
    %c0_13 = arith.constant 0 : index
    %16 = vector.load %arg4[%c0_12, %c0_13] : memref<256x128xf32, #tpu.memory_space<vmem>>, vector<256x128xf32>
    %cst_14 = arith.constant dense<0.000000e+00> : vector<16x128xf32>
    %17 = tpu.matmul %15, %16, %cst_14 {dimension_numbers = #tpu.dot_dimension_numbers<[1], [0], [0], [1], [0, 0, 1, 1], [], []>} : vector<16x256xf32>, vector<256x128xf32>, vector<16x128xf32> -> vector<16x128xf32>
    %18 = vector.broadcast %2 : vector<1x128xf32> to vector<16x128xf32>
    %19 = arith.addf %17, %18 : vector<16x128xf32>
    %c0_15 = arith.constant 0 : index
    %c0_16 = arith.constant 0 : index
    %20 = vector.load %arg6[%c0_15, %c0_16] : memref<16x128xf32, #tpu.memory_space<vmem>>, vector<16x128xf32>
    tpu.vector_store %arg6[%c0_15, %c0_16], %19 {strides = array<i32>} : memref<16x128xf32, #tpu.memory_space<vmem>>, vector<16x128xf32>,
    return
  }
  func.func @transform_0(%arg0: i32) -> (i32, i32) {
    %c0_i32 = arith.constant 0 : i32
    %c0_i32_0 = arith.constant 0 : i32
    return %arg0, %c0_i32 : i32, i32
  }
  func.func @transform_1(%arg0: i32) -> (i32, i32) {
    %c0_i32 = arith.constant 0 : i32
    %c0_i32_0 = arith.constant 0 : i32
    %c0_i32_1 = arith.constant 0 : i32
    return %c0_i32, %c0_i32_0 : i32, i32
  }
  func.func @transform_2(%arg0: i32) -> (i32, i32) {
    %c0_i32 = arith.constant 0 : i32
    %c0_i32_0 = arith.constant 0 : i32
    %c0_i32_1 = arith.constant 0 : i32
    return %c0_i32, %c0_i32_0 : i32, i32
  }
  func.func @transform_3(%arg0: i32) -> (i32, i32) {
    %c0_i32 = arith.constant 0 : i32
    %c0_i32_0 = arith.constant 0 : i32
    %c0_i32_1 = arith.constant 0 : i32
    return %c0_i32, %c0_i32_0 : i32, i32
  }
  func.func @transform_4(%arg0: i32) -> (i32, i32) {
    %c0_i32 = arith.constant 0 : i32
    %c0_i32_0 = arith.constant 0 : i32
    %c0_i32_1 = arith.constant 0 : i32
    return %c0_i32, %c0_i32_0 : i32, i32
  }
  func.func @transform_5(%arg0: i32) -> (i32, i32) {
    %c0_i32 = arith.constant 0 : i32
    %c0_i32_0 = arith.constant 0 : i32
    return %arg0, %c0_i32 : i32, i32
  }
}

</mosaic_0001>

<bundles_post_ra>
// kernel: landmark_classifier_forward.1
= control target key start
LH: loop header
LB: loop body
LE: loop exit
PB: predicated region body
PF: predicated region fallthrough
CT: control target
= control target key end

     0   :  { %10 = vsyncpa [#allocation3], 0  ;;  %s1230_s0 = inlined_call_operand.hbm [shape: f32[32,63], index: 0, kind: input, shape index: {}]   ;;  %s1231_s1 = inlined_call_operand.hbm [shape: f32[63,128], index: 1, kind: input, shape index: {}]   ;;  %s1232_s2 = inlined_call_operand.hbm [shape: f32[128,256], index: 2, kind: input, shape index: {}]   ;;  %s1233_s3 = inlined_call_operand.hbm [shape: f32[256,128], index: 3, kind: input, shape index: {}]   ;;  %s1234_s4 = inlined_call_operand.hbm [shape: f32[1,512], index: 4, kind: input, shape index: {}]   ;;  %s1235_s5 = inlined_call_operand.hbm [shape: f32[32,128], index: 5, kind: output, shape index: {}]  }
   0x1   :  { %12 = vsyncpa [#allocation3 + $0x1], 0 }
   0x2   :  { %13 = vsyncpa [#allocation6], 0 }
   0x3   :  { %14 = vsyncpa [#allocation9], 0 }
   0x4   :  { %15 = vsyncpa [#allocation4], 0 }
   0x5   :  { %17 = vsyncpa [#allocation4 + $0x1], 0  ;;  %s1048_s18 = smov 0   ;;  %s1050_s19 = smov 0  }
   0x6   :  { %s1052_s20 = smov 0   ;;  %s1054_s21 = smov 0  }
   0x7 LB: > { %s1069_s22 = sadd.s32 4294967295, %s1006_s21   ;;  %s660_s23 = sadd.s32 4294967294, %s1006_s21   ;;  %s1006_s21 = sphi %s1054_s21, %s1248_s21   ;;  %s1002_s20 = sphi %s1052_s20, %s1247_s20   ;;  %s998_s19 = sphi %s1050_s19, %s1246_s19   ;;  %s994_s18 = sphi %s1048_s18, %s1245_s18  }
   0x8   : > { %p43_p0 = scmp.ne.s32.totalorder %s998_s19, %s994_s18  ;;  %p44_p1 = scmp.eq.s32.totalorder %s1069_s22, 0 }
   0x9   : > { %p151_p2 = scmp.eq.s32.totalorder %s1069_s22, 1  ;;  %p157_p3 = scmp.eq.s32.totalorder %s660_s23, 1 }
   0xa   : > { %p1078_p4 = por %p44_p1, %p43_p0  ;;  %p661_p5 = scmp.ge.s32.totalorder %s1006_s21, 1 }
   0xb   : > { %p1083_p6 = por %p157_p3, %p43_p0  ;;  %p164_p7 = scmp.lt.s32.totalorder %s1006_s21, 3 }
   0xc   : > { %s175_s28 = sshll.u32 %s1231_s1, 4  ;;  %s1008_s30 = smov [#allocation5]   ;;  %s176_s28 = int_to_ptr.hbm [resolvable:$true] %s175_s28 }
   0xd   : > { %p1091_p8 = pnand %p661_p5, %p164_p7  ;;  %s177_s6 = sshll.u32 %s1008_s30, 4  ;;  %s178_s6 = int_to_ptr.vmem [resolvable:$true] %s177_s6 }
   0xe   : > { %s203_s10 = sshll.u32 %s1233_s3, 4  ;;  %s1236_s11 = smov 128   ;;  %s204_s10 = int_to_ptr.hbm [resolvable:$true] %s203_s10 }
   0xf   : > { %p707_p9 = pneg %p1091_p8  ;;  %s1010_s12 = smov 8  }
  0x10   : > { %s1011_s13 = smov [#allocation8]   ;;  %s189_s17 = sshll.u32 %s1232_s2, 4  ;;  %s190_s17 = int_to_ptr.hbm [resolvable:$true] %s189_s17 }
  0x11   : > { %p1099_p10 = pnand %p707_p9, %p44_p1  ;;  %s205_s14 = sshll.u32 %s1011_s13, 4  ;;  %s206_s14 = int_to_ptr.vmem [resolvable:$true] %s205_s14 }
  0x12   : > { %s1012_s23 = smov [#allocation7]   ;;  %s218_s30 = sshll.u32 %s1234_s4, 4  ;;  %s219_s30 = int_to_ptr.hbm [resolvable:$true] %s218_s30 }
  0x13   : > { %710 = dma.hbm_to_vmem [thread:$0]  (!%p1099_p10), %s176_s28, 1024, %s178_s6, [#allocation6], %s1236_s11, %s1236_s11, %s1010_s12  }
  0x14   : > { %716 = dma.hbm_to_vmem [thread:$0]  (!%p1099_p10), %s204_s10, 4096, %s206_s14, [#allocation9], %s1236_s11, %s1236_s11, %s1010_s12  }
  0x15   : > { %s191_s26 = sshll.u32 %s1012_s23, 4  ;;  %s1013_s6 = smov 256   ;;  %s192_s26 = int_to_ptr.vmem [resolvable:$true] %s191_s26 }
  0x16   : > { %s1014_s8 = smov 16   ;;  %s1015_s9 = smov [#allocation10]  }
  0x17   : > { %713 = dma.hbm_to_vmem [thread:$0]  (!%p1099_p10), %s190_s17, 4096, %s192_s26, [#allocation6], %s1013_s6, %s1013_s6, %s1014_s8  }
  0x18   : > { %s220_s10 = sshll.u32 %s1015_s9, 4  ;;  %s1128_s13 = sadd.s32 1, %s1006_s21   ;;  %s221_s10 = int_to_ptr.vmem [resolvable:$true] %s220_s10 }
  0x19   : > { %719 = dma.hbm_to_vmem [thread:$0]  (!%p1099_p10), %s219_s30, 64, %s221_s10, [#allocation9]  }
  0x1a   : > { %s30_s14 = sadd.s32 1, %s1002_s20  ;;  %s27_s15 = ssub.s32 %s1006_s21, %s1128_s13 }
  0x1b   : > { %p37_p12 = scmp.ne.s32.totalorder %s1002_s20, %s998_s19  ;;  %p28_p13 = scmp.eq.s32.totalorder %s27_s15, 0 }
  0x1c   : > { %p38_p0 = scmp.eq.s32.totalorder %s1006_s21, 0  ;;  %p732_p5 = scmp.lt.s32.totalorder %s1006_s21, 2 }
  0x1d   : > { %p1138_p3 = por %p151_p2, %p37_p12  ;;  %s231_s23 = sand.u32 1, %s1002_s20  }
  0x1e   : > { %s1144_s17 = scalar_select %p28_p13, %s1002_s20, %s30_s14  }
  0x1f   : > { %p39_p7 = por %p38_p0, %p37_p12  ;;  %s667_s7 = sshll.u32 %s231_s23, 4 }
  0x20   : > { %s685_s26 = sshll.u32 %s1006_s21, 4  ;;  %s235_s6 = scalar_lea.vmem [#allocation2], %s667_s7 }
  0x21   : > { %s240_s30 = scalar_lea.hbm %s1230_s0, %s685_s26  ;;  %s243_s8 = sshll.u32 %s235_s6, 4  ;;  %s244_s8 = int_to_ptr.vmem [resolvable:$true] %s243_s8 }
  0x22   : > { %s241_s9 = sshll.u32 %s240_s30, 4  ;;  %p1151_p2 = pnand %p732_p5, %p39_p7  ;;  %s242_s9 = int_to_ptr.hbm [resolvable:$true] %s241_s9 }
  0x23   : > { %s232_s14 = scalar_lea.sflag [#allocation3], %s231_s23  ;;  %s902_s15 = sshra.s32 %s242_s9, 4  ;;  %s903_s15 = int_to_ptr.hbm [resolvable:$true] %s902_s15 }
  0x24   : > { %s904_s11 = scalar_lea.hbm %s903_s15, 16  ;;  %p906_p10 = pneg %p1151_p2 }
  0x25   : > { %p905_p9 = scmp.ne.s32.totalorder %s903_s15, %s904_s11  ;;  %s909_s27 = scalar_lea.hbm %s1230_s0, 32 }
  0x26   : > { %p910_p0 = scmp.lt.s32.totalorder %s903_s15, %s1230_s0  ;;  %p911_p5 = scmp.lt.s32.totalorder %s909_s27, %s904_s11 }
  0x27   : > { %p907_p12 = pnand %p906_p10, %p905_p9 }
  0x28   : > { %p912_p7 = por %p911_p5, %p910_p0 }
  0x29   : > { %p908_p13 = pneg %p907_p12 }
  0x2b   : > { %p913_p11 = pnand %p912_p7, %p908_p13 }
  0x2d   : > { %916 = shalt.err (!%p913_p11)
}
  0x2e   : > { %s1243_s23 = smov 128   ;;  %255 = sbr.rel (%p1091_p8) target bundleno = 480 (0x1e0), region = 40 }
  0x2f   : > { %723 = dma.hbm_to_vmem [thread:$0]  (!%p1151_p2), %s242_s9, 256, %s244_s8, %s232_s14, %s1243_s23, %s1243_s23, %s1010_s12  }
  0x30   : > { %s1171_s6 = sand.u32 (!%p1091_p8), 1, %s998_s19  }
  0x31   : > { %s671_s11 = sshll.u32 (!%p1091_p8), %s1171_s6, 4  ;;  %s258_s15 = scalar_lea.sflag (!%p1091_p8), [#allocation3], %s1171_s6 }
  0x32   : > { %s1177_s26 = scalar_lea.vmem (!%p1091_p8), [#allocation2], %s671_s11 }
  0x33   : > { %977 = dma.done.wait (%p1078_p4), %s258_s15, 256  }
  0x34   : > { %979 = vsyncadd (%p1078_p4), %s258_s15, 4294967040 }
  0x35   : > { %981 = dma.done.wait (%p44_p1), [#allocation6], 5120  }
  0x36   : > { %983 = vsyncadd (%p44_p1), [#allocation6], 4294962176 }
  0x37   : > { %985 = dma.done.wait (%p44_p1), [#allocation9], 4160  }
  0x38   : > { %987 = vsyncadd (%p44_p1), [#allocation9], 4294963136  ;;  %vm334_vm0 = vcmask 1046528   ;;  %v323_v0 = vld [vmem:[#allocation5 + $0x38] sm:$0x7f]  ;;  %v322_v1 = vld [vmem:[#allocation5 + $0x30] sm:$0xff] }
  0x39   : > { %677 = vmatpush.msk.msra.mxu0 %vm334_vm0, %v323_v0  ;;  %v321_v2 = vld [vmem:[#allocation5 + $0x28] sm:$0xff]  ;;  %v393_v3 = vld [vmem:[#allocation7 + $0xf0] sm:$0xff]  ;;  %v394_v4 = vld [vmem:[#allocation7 + $0xf8] sm:$0xff]  ;;  %vm327_vm1 = vcmask 515072   ;;  %s686_s24 = sshll.u32 %s1069_s22, 4  ;;  %s308_s9 = scalar_lea.vmem [#allocation11], %s671_s11 }
  0x3a   : > { %v320_v5 = vld [vmem:[#allocation5 + $0x20] sm:$0xff]  ;;  %400 = vmatpush.msra.mxu1 %v393_v3  ;;  %423 = vmatpush.msra.mxu2 %v394_v4  ;;  %v392_v7 = vld [vmem:[#allocation7 + $0xe8] sm:$0xff]  ;;  %v389_v8 = vld [vmem:[#allocation7 + $0xd0] sm:$0xff]  ;;  %s545_s8 = scalar_lea.hbm %s1235_s5, %s686_s24  ;;  %s546_s10 = sshll.u32 %s308_s9, 4  ;;  %s547_s10 = int_to_ptr.vmem [resolvable:$true] %s546_s10 }
  0x3b   : > { %347 = vmatpush.msra.mxu0 %v322_v1  ;;  %v391_v6 = vld [vmem:[#allocation7 + $0xe0] sm:$0xff]  ;;  %v390_v9 = vld [vmem:[#allocation7 + $0xd8] sm:$0xff]  ;;  %v388_v12 = vld [vmem:[#allocation7 + $0xc8] sm:$0xff]  ;;  %s548_s14 = sshll.u32 %s545_s8, 4  ;;  %s534_s7 = scalar_lea.sflag [#allocation4], %s1171_s6  ;;  %s549_s14 = int_to_ptr.hbm [resolvable:$true] %s548_s14 }
  0x3c   : > { %v319_v10 = vld [vmem:[#allocation5 + $0x18] sm:$0xff]  ;;  %401 = vmatpush.msra.mxu1 %v391_v6  ;;  %424 = vmatpush.msra.mxu2 %v392_v7  ;;  %v387_v11 = vld [vmem:[#allocation7 + $0xc0] sm:$0xff]  ;;  %v318_v13 = vld [vmem:[#allocation5 + $0x10] sm:$0xff]  ;;  %s946_s22 = sshra.s32 %s549_s14, 4  ;;  %s952_s23 = scalar_lea.hbm %s1235_s5, 32  ;;  %s947_s22 = int_to_ptr.hbm [resolvable:$true] %s946_s22 }
  0x3d   : > { %348 = vmatpush.msra.mxu0 %v321_v2  ;;  %v385_v14 = vld [vmem:[#allocation7 + $0xb0] sm:$0xff]  ;;  %v386_v15 = vld [vmem:[#allocation7 + $0xb8] sm:$0xff]  ;;  %v317_v16 = vld [vmem:[#allocation5 + $0x8] sm:$0xff]  ;;  %s948_s27 = scalar_lea.hbm %s947_s22, 16  ;;  %p953_p11 = scmp.lt.s32.totalorder %s947_s22, %s1235_s5 }
  0x3e   : > { %402 = vmatpush.msra.mxu1 %v389_v8  ;;  %425 = vmatpush.msra.mxu2 %v390_v9  ;;  %v383_v17 = vld [vmem:[#allocation7 + $0xa0] sm:$0xff]  ;;  %v384_v18 = vld [vmem:[#allocation7 + $0xa8] sm:$0xff]  ;;  %v381_v21 = vld [vmem:[#allocation7 + $0x90] sm:$0xff]  ;;  %p949_p1 = scmp.ne.s32.totalorder %s947_s22, %s948_s27  ;;  %p954_p2 = scmp.lt.s32.totalorder %s952_s23, %s948_s27 }
  0x3f   : > { %349 = vmatpush.msra.mxu0 %v320_v5  ;;  %v316_v19 = vld [vmem:[#allocation5] sm:$0xff]  ;;  %v382_v22 = vld [vmem:[#allocation7 + $0x98] sm:$0xff]  ;;  %v380_v24 = vld [vmem:[#allocation7 + $0x88] sm:$0xff] }
  0x40   : > { %403 = vmatpush.msra.mxu1 %v387_v11  ;;  %426 = vmatpush.msra.mxu2 %v388_v12  ;;  %v314_v20 = vld [vmem:[%s1177_s26] sm:$0xff]  ;;  %v378_v26 = vld [vmem:[#allocation7 + $0x78] sm:$0xff]  ;;  %v376_v28 = vld [vmem:[#allocation7 + $0x68] sm:$0xff]  ;;  %p950_p4 = pnand %p949_p1, %p1138_p3  ;;  %p955_p9 = por %p954_p2, %p953_p11 }
  0x41   : > { %350 = vmatpush.msra.mxu0 %v319_v10  ;;  %v379_v23 = vld [vmem:[#allocation7 + $0x80] sm:$0xff]  ;;  %v377_v25 = vld [vmem:[#allocation7 + $0x70] sm:$0xff]  ;;  %v315_v29 = vld [vmem:[%s1177_s26 + $0x8] sm:$0xff] }
  0x42   : > { %404 = vmatpush.msra.mxu1 %v385_v14  ;;  %427 = vmatpush.msra.mxu2 %v386_v15  ;;  %v375_v27 = vld [vmem:[#allocation7 + $0x60] sm:$0xff]  ;;  %v373_v30 = vld [vmem:[#allocation7 + $0x50] sm:$0xff]  ;;  %v374_v31 = vld [vmem:[#allocation7 + $0x58] sm:$0xff]  ;;  %p951_p8 = pneg %p950_p4 }
  0x43   : > { %351 = vmatpush.msra.mxu0 %v318_v13  ;;  %v371_v32 = vld [vmem:[#allocation7 + $0x40] sm:$0xff]  ;;  %v372_v33 = vld [vmem:[#allocation7 + $0x48] sm:$0xff]  ;;  %v369_v34 = vld [vmem:[#allocation7 + $0x30] sm:$0xff] }
  0x44   : > { %405 = vmatpush.msra.mxu1 %v383_v17  ;;  %428 = vmatpush.msra.mxu2 %v384_v18  ;;  %v370_v35 = vld [vmem:[#allocation7 + $0x38] sm:$0xff]  ;;  %v367_v36 = vld [vmem:[#allocation7 + $0x20] sm:$0xff]  ;;  %v368_v37 = vld [vmem:[#allocation7 + $0x28] sm:$0xff]  ;;  %p956_p10 = pnand %p955_p9, %p951_p8 }
  0x45   : > { %352 = vmatpush.msra.mxu0 %v317_v16  ;;  %v365_v38 = vld [vmem:[#allocation7 + $0x10] sm:$0xff]  ;;  %v366_v39 = vld [vmem:[#allocation7 + $0x18] sm:$0xff]  ;;  %v363_v40 = vld [vmem:[#allocation7] sm:$0xff] }
  0x46   : > { %406 = vmatpush.msra.mxu1 %v381_v21  ;;  %429 = vmatpush.msra.mxu2 %v382_v22  ;;  %v364_v41 = vld [vmem:[#allocation7 + $0x8] sm:$0xff]  ;;  %v465_v42 = vld [vmem:[#allocation8 + $0x78] sm:$0xff]  ;;  %v464_v43 = vld [vmem:[#allocation8 + $0x70] sm:$0xff] }
  0x47   : > { %353 = vmatpush.msra.mxu0 %v316_v19  ;;  %485 = vmatpush.msra.mxu3 %v465_v42  ;;  %v481_v44 = vld [vmem:[#allocation8 + $0xf8] sm:$0xff]  ;;  %v463_v45 = vld [vmem:[#allocation8 + $0x68] sm:$0xff]  ;;  %v480_v46 = vld [vmem:[#allocation8 + $0xf0] sm:$0xff] }
  0x48   : > { %678 = vmatmul.msk.f32.vlgmr.msra.gmra.mxu0 %vm327_vm1, %v314_v20  ;;  %407 = vmatpush.msra.mxu1 %v379_v23  ;;  %v479_v47 = vld [vmem:[#allocation8 + $0xe8] sm:$0xff]  ;;  %v462_v48 = vld [vmem:[#allocation8 + $0x60] sm:$0xff]  ;;  %v461_v50 = vld [vmem:[#allocation8 + $0x58] sm:$0xff] }
  0x49   : > { %430 = vmatpush.msra.mxu2 %v380_v24  ;;  %508 = vmatpush.msrb.mxu0 %v481_v44  ;;  %v478_v49 = vld [vmem:[#allocation8 + $0xe0] sm:$0xff]  ;;  %v477_v51 = vld [vmem:[#allocation8 + $0xd8] sm:$0xff]  ;;  %v460_v52 = vld [vmem:[#allocation8 + $0x50] sm:$0xff] }
  0x4a   : > { %408 = vmatpush.msra.mxu1 %v377_v25  ;;  %486 = vmatpush.msra.mxu3 %v464_v43  ;;  %v476_v53 = vld [vmem:[#allocation8 + $0xd0] sm:$0xff]  ;;  %v459_v54 = vld [vmem:[#allocation8 + $0x48] sm:$0xff]  ;;  %v458_v56 = vld [vmem:[#allocation8 + $0x40] sm:$0xff] }
  0x4b   : > { %431 = vmatpush.msra.mxu2 %v378_v26  ;;  %509 = vmatpush.msrb.mxu0 %v480_v46  ;;  %v475_v55 = vld [vmem:[#allocation8 + $0xc8] sm:$0xff]  ;;  %v474_v57 = vld [vmem:[#allocation8 + $0xc0] sm:$0xff]  ;;  %v457_v58 = vld [vmem:[#allocation8 + $0x38] sm:$0xff] }
  0x4c   : > { %409 = vmatpush.msra.mxu1 %v375_v27  ;;  %487 = vmatpush.msra.mxu3 %v463_v45  ;;  %v473_v59 = vld [vmem:[#allocation8 + $0xb8] sm:$0xff]  ;;  %v780_v60 = vld [vmem:[#allocation10] ss:$0 sm:$0xff]  ;;  %v456_v61 = vld [vmem:[#allocation8 + $0x30] sm:$0xff] }
  0x4d   : > { %432 = vmatpush.msra.mxu2 %v376_v28  ;;  %510 = vmatpush.msrb.mxu0 %v479_v47  ;;  %v472_v62 = vld [vmem:[#allocation8 + $0xb0] sm:$0xff]  ;;  %v455_v63 = vld [vmem:[#allocation8 + $0x28] sm:$0xff]  ;;  %v454_v2 = vld [vmem:[#allocation8 + $0x20] sm:$0xff] }
  0x4e   : > { %410 = vmatpush.msra.mxu1 %v373_v30  ;;  %488 = vmatpush.msra.mxu3 %v462_v48  ;;  %v453_v4 = vld [vmem:[#allocation8 + $0x18] sm:$0xff]  ;;  %v452_v8 = vld [vmem:[#allocation8 + $0x10] sm:$0xff]  ;;  %v471_v9 = vld [vmem:[#allocation8 + $0xa8] sm:$0xff] }
  0x4f   : > { %433 = vmatpush.msra.mxu2 %v374_v31  ;;  %511 = vmatpush.msrb.mxu0 %v478_v49  ;;  %v451_v10 = vld [vmem:[#allocation8 + $0x8] sm:$0xff]  ;;  %v470_v11 = vld [vmem:[#allocation8 + $0xa0] sm:$0xff]  ;;  %v469_v13 = vld [vmem:[#allocation8 + $0x98] sm:$0xff] }
  0x50   : > { %679 = vmatmul.msk.f32.gmra.mxu0 %vm327_vm1, %v315_v29  ;;  %411 = vmatpush.msra.mxu1 %v371_v32  ;;  %v450_v12 = vld [vmem:[#allocation8] sm:$0xff]  ;;  %v468_v14 = vld [vmem:[#allocation8 + $0x90] sm:$0xff]  ;;  %v467_v15 = vld [vmem:[#allocation8 + $0x88] sm:$0xff] }
  0x51   : > { %434 = vmatpush.msra.mxu2 %v372_v33  ;;  %489 = vmatpush.msra.mxu3 %v461_v50  ;;  %v466_v16 = vld [vmem:[#allocation8 + $0x80] sm:$0xff] }
  0x52   : > { %412 = vmatpush.msra.mxu1 %v369_v34  ;;  %512 = vmatpush.msrb.mxu0 %v477_v51  ;;  %v312_v17 = vld [vmem:[#allocation10 + $0x1] sm:$0x3]  ;;  %v781_v32 = vld [vmem:[#allocation10 + $0x3] ss:$0 sm:$0xff] }
  0x53   : > { %435 = vmatpush.msra.mxu2 %v370_v35  ;;  %490 = vmatpush.msra.mxu3 %v460_v52  ;;  %v396_v18 = vperm.slane %v312_v17, 0  ;;  %v397_v22 = vperm.slane %v312_v17, 1 }
  0x54   : > { %413 = vmatpush.msra.mxu1 %v367_v36  ;;  %513 = vmatpush.msrb.mxu0 %v476_v53 }
  0x55   : > { %436 = vmatpush.msra.mxu2 %v368_v37  ;;  %491 = vmatpush.msra.mxu3 %v459_v54 }
  0x56   : > { %414 = vmatpush.msra.mxu1 %v365_v38  ;;  %514 = vmatpush.msrb.mxu0 %v475_v55 }
  0x57   : > { %437 = vmatpush.msra.mxu2 %v366_v39  ;;  %492 = vmatpush.msra.mxu3 %v458_v56 }
  0x58   : > { %415 = vmatpush.msra.mxu1 %v363_v40  ;;  %515 = vmatpush.msrb.mxu0 %v474_v57 }
  0x59   : > { %438 = vmatpush.msra.mxu2 %v364_v41  ;;  %493 = vmatpush.msra.mxu3 %v457_v58 }
  0x5a   : > { %516 = vmatpush.msrb.mxu0 %v473_v59 }
  0x5b   : > { %494 = vmatpush.msra.mxu3 %v456_v61 }
  0x5c   : > { %517 = vmatpush.msrb.mxu0 %v472_v62 }
  0x5d   : > { %495 = vmatpush.msra.mxu3 %v455_v63 }
  0x5e   : > { %518 = vmatpush.msrb.mxu0 %v471_v9 }
  0x5f   : > { %496 = vmatpush.msra.mxu3 %v454_v2 }
  0x60   : > { %519 = vmatpush.msrb.mxu0 %v470_v11 }
  0x61   : > { %497 = vmatpush.msra.mxu3 %v453_v4 }
  0x62   : > { %520 = vmatpush.msrb.mxu0 %v469_v13 }
  0x63   : > { %498 = vmatpush.msra.mxu3 %v452_v8 }
  0x64   : > { %521 = vmatpush.msrb.mxu0 %v468_v14 }
  0x65   : > { %499 = vmatpush.msra.mxu3 %v451_v10 }
  0x66   : > { %522 = vmatpush.msrb.mxu0 %v467_v15 }
  0x67   : > { %500 = vmatpush.msra.mxu3 %v450_v12 }
  0x68   : > { %523 = vmatpush.msrb.mxu0 %v466_v16 }
  0xc5   : > { %v355_v0 = vpop.f32.mrf.mxu0 }
  0xc6   : > { %v356_v1 = vadd.f32 %v780_v60, %v355_v0 }
  0xc8   : > { %v361_v3 = vmax.f32 %v356_v1, 0.0 }
  0xca   : > { %416 = vmatmul.f32.vlgmr.msra.gmra.mxu1 %v361_v3  ;;  %439 = vmatmul.f32.vlgmr.msra.gmra.mxu2 %v361_v3 }
  0xcd   : > { %v358_v5 = vpop.f32.mrf.mxu0 }
  0xce   : > { %v359_v6 = vadd.f32 %v780_v60, %v358_v5 }
  0xd0   : > { %v362_v7 = vmax.f32 %v359_v6, 0.0 }
  0xd2   : > { %419 = vmatmul.f32.gmra.mxu1 %v362_v7  ;;  %442 = vmatmul.f32.gmra.mxu2 %v362_v7 }
 0x147   : > { %v417_v19 = vpop.f32.mrf.mxu1 }
 0x148   : > { %v418_v20 = vadd.f32 %v417_v19, %v396_v18 }
 0x14a   : > { %v446_v21 = vmax.f32 %v418_v20, 0.0 }
 0x14c   : > { %501 = vmatmul.f32.vlgmr.msra.gmra.mxu3 %v446_v21 }
 0x14d   : > { %v440_v23 = vpop.f32.mrf.mxu2 }
 0x14e   : > { %v441_v24 = vadd.f32 %v440_v23, %v397_v22 }
 0x14f   : > { %v420_v25 = vpop.f32.mrf.mxu1 }
 0x150   : > { %v447_v26 = vmax.f32 %v441_v24, 0.0  ;;  %v421_v27 = vadd.f32 %v420_v25, %v396_v18 }
 0x152   : > { %v448_v28 = vmax.f32 %v421_v27, 0.0  ;;  %524 = vmatmul.f32.vlgmr.msrb.gmra.mxu0 %v447_v26 }
 0x154   : > { %504 = vmatmul.f32.gmra.mxu3 %v448_v28 }
 0x155   : > { %v443_v29 = vpop.f32.mrf.mxu2 }
 0x156   : > { %v444_v30 = vadd.f32 %v443_v29, %v397_v22 }
 0x158   : > { %v449_v31 = vmax.f32 %v444_v30, 0.0 }
 0x15a   : > { %527 = vmatmul.f32.gmra.mxu0 %v449_v31 }
 0x1cf   : > { %v502_v33 = vpop.f32.mrf.mxu3  ;;  %v525_v34 = vpop.f32.mrf.mxu0 }
 0x1d0   : > { %v503_v35 = vadd.f32 %v781_v32, %v502_v33 }
 0x1d2   : > { %v526_v36 = vadd.f32 %v525_v34, %v503_v35 }
 0x1d4   : > { %531 = vst [vmem:[%s308_s9] sm:$0xff] %v526_v36 }
 0x1d7   : > { %v505_v37 = vpop.f32.mrf.mxu3  ;;  %v528_v39 = vpop.f32.mrf.mxu0 }
 0x1d8   : > { %v506_v38 = vadd.f32 %v781_v32, %v505_v37 }
 0x1da   : > { %v529_v40 = vadd.f32 %v528_v39, %v506_v38 }
 0x1dc   : > { %532 = vst [vmem:[%s308_s9 + $0x8] sm:$0xff] %v529_v40 }
 0x1dd   : > { %959 = shalt.err (!%p956_p10)
}
 0x1de   : > { %s1016_s6 = smov 128   ;;  %s1017_s26 = smov 8  }
 0x1df   : > { %705 = dma.vmem_to_hbm [thread:$0]  (%p1138_p3), %s547_s10, 256, %s549_s14, %s534_s7, %s1016_s6, %s1016_s6, %s1017_s26  }
 0x1e0 PF: > { %s563_s24 = sand.u32 1, %s994_s18   ;;  %p1244_p12 = scmp.ge.s32.totalorder %s1006_s21, 2 }
 0x1e1   : > { %s564_s29 = scalar_lea.sflag [#allocation4], %s563_s24 }
 0x1e2   : > { %p725_p13 = pnand %p1244_p12, %p1083_p6 }
 0x1e4   : > { %p726_p0 = pneg %p725_p13 }
 0x1e6   : > { %989 = dma.done.wait (%p726_p0), %s564_s29, 256  }
 0x1e7   : > { %991 = vsyncadd (%p726_p0), %s564_s29, 4294967040  ;;  %p20_p5 = scmp.ge.s32.totalorder %s1128_s13, 4   ;;  %s1245_s18 = smov %s998_s19 }
 0x1e8   : > { %s1246_s19 = smov %s1002_s20  ;;  %s1247_s20 = smov %s1144_s17 }
 0x1e9   : > { %s1248_s21 = smov %s1128_s13  ;;  %22 = sbr.rel (!%p20_p5) target bundleno = 7 (0x7), region = 101 }
 0x1ee   :  { %570 = vsyncpa [#allocation3], 1 }
 0x1ef   :  { %572 = vsyncpa [#allocation3 + $0x1], 1 }
 0x1f0   :  { %573 = vsyncpa [#allocation6], 1 }
 0x1f1   :  { %574 = vsyncpa [#allocation9], 1 }
 0x1f2   :  { %575 = vsyncpa [#allocation4], 1 }
 0x1f3   :  { %577 = vsyncpa [#allocation4 + $0x1], 1 }

</bundles_post_ra>
